<compile_context>
chip_gen: v5e
topology: v5e:2x2
jax: 0.10.0
libtpu: 0.0.40
codegen_flags: <defaults>
</compile_context>

<pallas_src>
import jax
import jax.numpy as jnp
from jax.experimental import pallas as pl
from jax.experimental.pallas import tpu as pltpu


_BLOCK_ELEMS = 2048 * 512   # ~4 MiB of f32 per grid step (per-block element budget)


def _sigmoide_kernel(x_ref, o_ref):
    x = x_ref[...].astype(jnp.float32)
    # prevent_overflow: clip to [-200, 200] (cheap VPU work, hidden under HBM bound)
    x = jnp.clip(x, -200.0, 200.0)
    # Exact reference formulation: 1 / (1 + exp(-x))
    o_ref[...] = (1.0 / (1.0 + jnp.exp(-x))).astype(o_ref.dtype)


def _pick_lanes(total):
    """Largest lane-dense width in {512, 256, 128} dividing the element count."""
    for lanes in (512, 256, 128):
        if total % lanes == 0:
            return lanes
    return None


def _pick_block_rows(rows, lanes):
    """Rows per block: multiple of 8 (or the full dim), ~4 MiB per block, and a
    grid of >= 2 steps so both v7x TensorCores get work on medium inputs."""
    if rows <= 16:
        return rows                                   # tiny input: one full-dim block
    max_rows = max(8, _BLOCK_ELEMS // lanes)           # ~4 MiB f32 block
    half = max(8, (pl.cdiv(rows, 2) // 8) * 8)         # >= 2 blocks, 8-aligned
    return min(max_rows, half)


def sigmoide_forward(x):
    """Elementwise sigmoid with overflow clipping, computed in a Pallas kernel."""
    orig_shape = x.shape
    out_dtype = x.dtype if jnp.issubdtype(x.dtype, jnp.floating) else jnp.float32
    total = x.size
    if total == 0:
        return jnp.zeros(orig_shape, out_dtype)

    x_flat = jnp.ravel(x)                              # contiguous: layout-level, free
    lanes = _pick_lanes(total)
    padded = total
    if lanes is None:
        # Rare fallback (element count not a multiple of 128): pad the flat
        # array up to 128 lanes. Costs one extra HBM pass on input (pad) and
        # one on output (slice); all 128-aligned sizes avoid this entirely.
        lanes = 128
        padded = ((total + lanes - 1) // lanes) * lanes
        x_flat = jnp.pad(x_flat, (0, padded - total))

    rows = padded // lanes
    x2d = x_flat.reshape(rows, lanes)
    tr = _pick_block_rows(rows, lanes)
    grid = (pl.cdiv(rows, tr),)                        # ragged last block masked by Pallas

    y2d = pl.pallas_call(
        _sigmoide_kernel,
        out_shape=jax.ShapeDtypeStruct((rows, lanes), out_dtype),
        grid_spec=pltpu.PrefetchScalarGridSpec(
            num_scalar_prefetch=0,
            grid=grid,
            in_specs=[pl.BlockSpec((tr, lanes), lambda i: (i, 0))],
            out_specs=pl.BlockSpec((tr, lanes), lambda i: (i, 0)),
        ),
        compiler_params=pltpu.CompilerParams(
            dimension_semantics=("parallel",),          # shards grid across v7x's 2 TCs
            vmem_limit_bytes=32 * 1024 * 1024,          # 4 MiB blocks, double-buffered in+out
        ),
    )(x2d)

    y_flat = y2d.reshape(-1)
    if padded != total:
        y_flat = y_flat[:total]
    return y_flat.reshape(orig_shape)


def _ref_sigmoid_f32(x):
    x32 = jnp.clip(x.astype(jnp.float32), -200.0, 200.0)
    return 1.0 / (1.0 + jnp.exp(-x32))


if __name__ == "__main__":
    key = jax.random.PRNGKey(0)
    k0, k1, k2, k3 = jax.random.split(key, 4)

    # 1) Small NCHW-like f32 input; scaled by 100 so the +/-200 clip region and
    #    saturation are exercised. (aligned path: total % 512 == 0)
    x = jax.random.normal(k0, (2, 4, 16, 16), dtype=jnp.float32) * 100.0
    y = sigmoide_forward(x)
    jax.block_until_ready(y)
    assert y.shape == x.shape and y.dtype == x.dtype
    assert jnp.max(jnp.abs(y - _ref_sigmoid_f32(x))) < 1e-5

    # 2) Medium aligned f32 input (exercises multi-step grid, no-pad path).
    x2 = jax.random.normal(k1, (4, 8, 32, 32), dtype=jnp.float32) * 5.0
    y2 = sigmoide_forward(x2)
    jax.block_until_ready(y2)
    assert jnp.max(jnp.abs(y2 - _ref_sigmoid_f32(x2))) < 1e-5

    # 3) bf16 input: output preserves bf16 dtype, compute stays f32 in-kernel.
    #    (128-aligned but not 512-aligned: adaptive lane width, no pad)
    x3 = (jax.random.normal(k2, (2, 3, 64), dtype=jnp.float32) * 5.0).astype(jnp.bfloat16)
    y3 = sigmoide_forward(x3)
    jax.block_until_ready(y3)
    assert y3.dtype == jnp.bfloat16 and y3.shape == x3.shape
    assert jnp.max(jnp.abs(y3.astype(jnp.float32) - _ref_sigmoid_f32(x3))) < 4e-3

    # 4) Awkward size not divisible by 128 (exercises the rare pad fallback).
    x4 = jax.random.normal(k3, (3, 5, 7, 11), dtype=jnp.float32) * 50.0
    y4 = sigmoide_forward(x4)
    jax.block_until_ready(y4)
    assert y4.shape == x4.shape
    assert jnp.max(jnp.abs(y4 - _ref_sigmoid_f32(x4))) < 1e-5

    print("KERNEL_OK")
</pallas_src>

<mosaic_0001>
module attributes {stable_mosaic.version = 11 : i64} {
  func.func @_sigmoide_kernel(%arg0: i32, %arg1: memref<4x512xf32, #tpu.memory_space<vmem>>, %arg2: memref<4x512xf32, #tpu.memory_space<vmem>>) attributes {dimension_semantics = [#tpu.dimension_semantics<parallel>], iteration_bounds = array<i64: 1>, scalar_prefetch = 0 : i64, scratch_operands = 0 : i64, tpu.core_type = #tpu.core_type<tc>, window_params = [{transform_indices = @transform_0, window_bounds = array<i64: 4, 512>}, {transform_indices = @transform_1, window_bounds = array<i64: 4, 512>}]} {
    %c0 = arith.constant 0 : index
    %c0_0 = arith.constant 0 : index
    %0 = vector.load %arg1[%c0, %c0_0] : memref<4x512xf32, #tpu.memory_space<vmem>>, vector<4x512xf32>
    %cst = arith.constant -2.000000e+02 : f32
    %cst_1 = arith.constant 2.000000e+02 : f32
    %1 = vector.broadcast %cst : f32 to vector<4x512xf32>
    %2 = arith.maximumf %1, %0 : vector<4x512xf32>
    %3 = vector.broadcast %cst_1 : f32 to vector<4x512xf32>
    %4 = arith.minimumf %3, %2 : vector<4x512xf32>
    %cst_2 = arith.constant 0.000000e+00 : f32
    %5 = vector.broadcast %cst_2 : f32 to vector<4x512xf32>
    %6 = arith.subf %5, %4 : vector<4x512xf32>
    %7 = math.exp %6 : vector<4x512xf32>
    %cst_3 = arith.constant 1.000000e+00 : f32
    %8 = vector.broadcast %cst_3 : f32 to vector<4x512xf32>
    %9 = arith.addf %8, %7 : vector<4x512xf32>
    %cst_4 = arith.constant 1.000000e+00 : f32
    %10 = vector.broadcast %cst_4 : f32 to vector<4x512xf32>
    %11 = arith.divf %10, %9 : vector<4x512xf32>
    %c0_5 = arith.constant 0 : index
    %c0_6 = arith.constant 0 : index
    %12 = vector.load %arg2[%c0_5, %c0_6] : memref<4x512xf32, #tpu.memory_space<vmem>>, vector<4x512xf32>
    tpu.vector_store %arg2[%c0_5, %c0_6], %11 {strides = array<i32>} : memref<4x512xf32, #tpu.memory_space<vmem>>, vector<4x512xf32>,
    return
  }
  func.func @transform_0(%arg0: i32) -> (i32, i32) {
    %c0_i32 = arith.constant 0 : i32
    %c0_i32_0 = arith.constant 0 : i32
    return %arg0, %c0_i32 : i32, i32
  }
  func.func @transform_1(%arg0: i32) -> (i32, i32) {
    %c0_i32 = arith.constant 0 : i32
    %c0_i32_0 = arith.constant 0 : i32
    return %arg0, %c0_i32 : i32, i32
  }
}

</mosaic_0001>

<bundles_post_ra>
// kernel: tpu_custom_call.1
= control target key start
LH: loop header
LB: loop body
LE: loop exit
PB: predicated region body
PF: predicated region fallthrough
CT: control target
= control target key end

     0   :  { %6 = vsyncpa [#allocation3], 0  ;;  %s168_s0 = inlined_call_operand.hbm [shape: f32[4,512], index: 0, kind: input, shape index: {}]   ;;  %s169_s1 = inlined_call_operand.hbm [shape: f32[4,512], index: 1, kind: output, shape index: {}]  }
   0x1   :  { %7 = vsyncpa [#allocation4], 0  ;;  %s13_s8 = sshll.u32 %s168_s0, 4  ;;  %s150_s9 = smov [#allocation2]   ;;  %s14_s8 = int_to_ptr.hbm [resolvable:$true] %s13_s8 }
   0x2   :  { %s15_s10 = sshll.u32 %s150_s9, 4  ;;  %s16_s10 = int_to_ptr.vmem [resolvable:$true] %s15_s10 }
   0x3   :  { %18 = dma.hbm_to_vmem [thread:$0]  %s14_s8, 256, %s16_s10, [#allocation3]  }
   0x4   :  { %146 = dma.done.wait [#allocation3], 256  }
   0x5   :  { %147 = vsyncadd [#allocation3], 4294967040  ;;  %v23_v0 = vld [vmem:[#allocation2] sm:$0xff]  ;;  %v24_v1 = vld [vmem:[#allocation2 + $0x8] sm:$0xff]  ;;  %s151_s0 = smov [#allocation5]   ;;  %s76_s14 = sshll.u32 %s169_s1, 4  ;;  %s77_s14 = int_to_ptr.hbm [resolvable:$true] %s76_s14 }
   0x6   :  { %v86_v2 = vclamps-f32 %v23_v0, 200.0  ;;  %v87_v3 = vclamps-f32 %v24_v1, 200.0  ;;  %s74_s11 = sshll.u32 %s151_s0, 4  ;;  %s75_s11 = int_to_ptr.vmem [resolvable:$true] %s74_s11 }
   0x8   :  { %v29_v4 = vsub.f32 0.0, %v86_v2  ;;  %v30_v5 = vsub.f32 0.0, %v87_v3 }
   0xa   :  { %v31_v6 = vmul.f32 1.442695, %v29_v4  ;;  %v33_v7 = vmul.f32 1.442695, %v30_v5 }
   0xc   :  { %90 = vpow2.f32 %v31_v6 }
   0xd   :  { %92 = vpow2.f32 %v33_v7 }
  0x12   :  { %v91_v8 = vpop.eup %90 }
  0x13   :  { %v93_v9 = vpop.eup %92  ;;  %v35_v10 = vadd.f32 1.0, %v91_v8 }
  0x14   :  { %v36_v11 = vadd.f32 1.0, %v93_v9 }
  0x15   :  { %94 = vrcp.f32 %v35_v10  ;;  %vm42_vm0 = vweird.f32 %v35_v10  ;;  %v48_v15 = vand.u32 2147483648, %v35_v10  ;;  %v46_v18 = vand.u32 2147483647, %v35_v10 }
  0x16   :  { %96 = vrcp.f32 %v36_v11  ;;  %v63_v19 = vand.u32 2147483648, %v36_v11  ;;  %vm57_vm2 = vweird.f32 %v36_v11  ;;  %v61_v21 = vand.u32 2147483647, %v36_v11 }
  0x17   :  { %v49_v23 = vor.u32 1.1754944e-38, %v48_v15  ;;  %vm47_vm5 = vcmp.eq.f32.partialorder %v46_v18, 8.507059e+37 }
  0x18   :  { %v64_v26 = vor.u32 1.1754944e-38, %v63_v19  ;;  %vm62_vm7 = vcmp.eq.f32.partialorder %v61_v21, 8.507059e+37 }
  0x1b   :  { %v95_v12 = vpop.eup %94 }
  0x1c   :  { %v97_v13 = vpop.eup %96  ;;  %v38_v14 = vmul.f32 %v95_v12, %v35_v10  ;;  %vm43_vm1 = vweird.f32 %v95_v12 }
  0x1d   :  { %v53_v16 = vmul.f32 %v97_v13, %v36_v11  ;;  %vm58_vm3 = vweird.f32 %v97_v13  ;;  %vm44_vm4 = vmor %vm42_vm0, %vm43_vm1 }
  0x1e   :  { %v39_v17 = vsub.f32 1.0, %v38_v14  ;;  %vm59_vm6 = vmor %vm57_vm2, %vm58_vm3 }
  0x1f   :  { %v54_v20 = vsub.f32 1.0, %v53_v16 }
  0x20   :  { %v40_v22 = vmul.f32 %v95_v12, %v39_v17 }
  0x21   :  { %v55_v24 = vmul.f32 %v97_v13, %v54_v20 }
  0x22   :  { %v41_v25 = vadd.f32 %v95_v12, %v40_v22 }
  0x23   :  { %v56_v27 = vadd.f32 %v97_v13, %v55_v24 }
  0x24   :  { %v45_v28 = vsel %vm44_vm4, %v95_v12, %v41_v25 }
  0x25   :  { %v50_v29 = vsel %vm47_vm5, %v49_v23, %v45_v28  ;;  %v60_v30 = vsel %vm59_vm6, %v97_v13, %v56_v27 }
  0x26   :  { %67 = vst [vmem:[#allocation5] sm:$0xff] %v50_v29  ;;  %v65_v31 = vsel %vm62_vm7, %v64_v26, %v60_v30 }
  0x27   :  { %68 = vst [vmem:[#allocation5 + $0x8] sm:$0xff] %v65_v31 }
  0x28   :  { %79 = dma.vmem_to_hbm [thread:$0]  %s75_s11, 256, %s77_s14, [#allocation4]  }
  0x29   :  { %148 = dma.done.wait [#allocation4], 256  }
  0x2a   :  { %149 = vsyncadd [#allocation4], 4294967040 }
  0x2b   :  { %84 = vsyncpa [#allocation3], 1 }
  0x2c   :  { %85 = vsyncpa [#allocation4], 1 }

</bundles_post_ra>
